<compile_context>
chip_gen: v6e
topology: v6e:2x2x1
jax: 0.10.0
libtpu: 0.0.40
codegen_flags: <defaults>
</compile_context>

<pallas_src>
import jax
import jax.numpy as jnp
from jax.experimental import pallas as pl
from jax.experimental.pallas import tpu as pltpu


def _round_up(x, m):
    return ((x + m - 1) // m) * m


def _nn_kernel(h_ref, w1_ref, b1_ref, w2_ref, b2_ref, w3_ref, b3_ref,
               logs_ref, t_ref):
    # Layer 1: Linear(d, d) + ReLU  (MXU, f32 accumulation; bias added in f32)
    x = jnp.dot(h_ref[...], w1_ref[...],
                preferred_element_type=jnp.float32) + b1_ref[...]
    x = jnp.maximum(x, 0.0)
    # Layer 2: Linear(d, d) + ReLU
    x = jnp.dot(x.astype(w2_ref.dtype), w2_ref[...],
                preferred_element_type=jnp.float32) + b2_ref[...]
    x = jnp.maximum(x, 0.0)
    # Layer 3: fused Linear(d, 2d) -> one MXU pass produces [logs | t].
    y = jnp.dot(x.astype(w3_ref.dtype), w3_ref[...],
                preferred_element_type=jnp.float32) + b3_ref[...]
    dp = logs_ref.shape[-1]
    # Two lane-aligned full-width stores (dp is a multiple of 128): unmasked
    # vst, and sigmoid (EUP exp/recip) only touches the logs half.
    logs_ref[...] = (jax.nn.sigmoid(y[:, :dp] + 2.0) + 1e-7).astype(logs_ref.dtype)
    t_ref[...] = y[:, dp:].astype(t_ref.dtype)


def init_params(key, dim, dtype=jnp.float32):
    """PyTorch-style Linear init: U(-1/sqrt(fan_in), 1/sqrt(fan_in))."""
    d = dim // 2
    keys = jax.random.split(key, 6)

    def linear(kw, kb, fan_in, fan_out):
        bound = 1.0 / jnp.sqrt(jnp.asarray(fan_in, dtype))
        # stored as (in, out): torch weight (out, in) transposed
        w = jax.random.uniform(kw, (fan_in, fan_out), dtype, -bound, bound)
        b = jax.random.uniform(kb, (1, fan_out), dtype, -bound, bound)
        return w, b

    w1, b1 = linear(keys[0], keys[1], d, d)
    w2, b2 = linear(keys[2], keys[3], d, d)
    w3, b3 = linear(keys[4], keys[5], d, 2 * d)       # fused (d, 2d)
    return dict(w1=w1, b1=b1, w2=w2, b2=b2, w3=w3, b3=b3)


def pad_params(params, multiple=128, compute_dtype=None):
    """Zero-pad feature dim to a lane-dense multiple; optionally cast weight
    matrices to compute_dtype (e.g. jnp.bfloat16 on v6e/v7x).  Biases stay f32
    (added after f32 MXU accumulation).  Call once, outside the hot loop."""
    d = params["w1"].shape[0]
    dp = _round_up(d, multiple)
    w_dt = compute_dtype if compute_dtype is not None else params["w1"].dtype
    zw = lambda shape: jnp.zeros(shape, w_dt)
    zb = lambda shape: jnp.zeros(shape, jnp.float32)

    w1 = zw((dp, dp)).at[:d, :d].set(params["w1"].astype(w_dt))
    b1 = zb((1, dp)).at[:, :d].set(params["b1"].astype(jnp.float32))
    w2 = zw((dp, dp)).at[:d, :d].set(params["w2"].astype(w_dt))
    b2 = zb((1, dp)).at[:, :d].set(params["b2"].astype(jnp.float32))
    # keep the [logs | t] halves aligned to the padded width dp
    w3 = zw((dp, 2 * dp))
    w3 = w3.at[:d, :d].set(params["w3"][:, :d].astype(w_dt))
    w3 = w3.at[:d, dp:dp + d].set(params["w3"][:, d:].astype(w_dt))
    b3 = zb((1, 2 * dp))
    b3 = b3.at[:, :d].set(params["b3"][:, :d].astype(jnp.float32))
    b3 = b3.at[:, dp:dp + d].set(params["b3"][:, d:].astype(jnp.float32))
    return dict(w1=w1, b1=b1, w2=w2, b2=b2, w3=w3, b3=b3)


def nn_forward(h, params):
    """h: (batch, d).  params: output of pad_params (feature dim mult. of 128)."""
    batch, d = h.shape
    dp = params["w1"].shape[0]
    w_dt = params["w1"].dtype
    out_dt = h.dtype

    # Row tile: sublane-aligned, >=2 grid steps once batch > 256 (so v7x's two
    # TensorCores both get work), capped at 256 so batch padding waste < 256.
    TM = min(256, max(8, _round_up(-(-batch // 2), 8)))
    padded_batch = _round_up(batch, TM)
    grid = (padded_batch // TM,)

    hp = h.astype(w_dt)
    if padded_batch != batch or dp != d:
        hp = jnp.zeros((padded_batch, dp), w_dt).at[:batch, :d].set(h.astype(w_dt))

    w_is = jnp.dtype(w_dt).itemsize
    o_is = jnp.dtype(out_dt).itemsize
    # VMEM footprint: single-buffered resident weights/biases, double-buffered
    # h tile and two out tiles, f32 intermediates (x, y); 1.5x + 2 MiB slack.
    resident = 4 * dp * dp * w_is + 4 * dp * 4
    pipelined = 2 * TM * dp * w_is + 2 * 2 * TM * dp * o_is
    interm = 6 * TM * dp * 4
    vmem_limit = max(8 << 20,
                     min(64 << 20,
                         int(1.5 * (resident + pipelined + interm)) + (2 << 20)))

    flops = 8 * padded_batch * dp * dp              # 2*B*dp*(dp + dp + 2dp)
    bytes_accessed = (hp.size * w_is
                      + sum(int(p.size) * jnp.dtype(p.dtype).itemsize
                            for p in params.values())
                      + 2 * padded_batch * dp * o_is)

    resident_mode = dict(pipeline_mode=pl.Buffered(1))  # constant index_map

    logs_p, t_p = pl.pallas_call(
        _nn_kernel,
        out_shape=(jax.ShapeDtypeStruct((padded_batch, dp), out_dt),
                   jax.ShapeDtypeStruct((padded_batch, dp), out_dt)),
        grid_spec=pltpu.PrefetchScalarGridSpec(
            num_scalar_prefetch=0,
            grid=grid,
            in_specs=[
                pl.BlockSpec((TM, dp), lambda i: (i, 0)),                      # h (pipelined)
                pl.BlockSpec((dp, dp), lambda i: (0, 0), **resident_mode),     # w1
                pl.BlockSpec((1, dp), lambda i: (0, 0), **resident_mode),      # b1
                pl.BlockSpec((dp, dp), lambda i: (0, 0), **resident_mode),     # w2
                pl.BlockSpec((1, dp), lambda i: (0, 0), **resident_mode),      # b2
                pl.BlockSpec((dp, 2 * dp), lambda i: (0, 0), **resident_mode), # w3 fused
                pl.BlockSpec((1, 2 * dp), lambda i: (0, 0), **resident_mode),  # b3
            ],
            out_specs=(pl.BlockSpec((TM, dp), lambda i: (i, 0)),   # logs
                       pl.BlockSpec((TM, dp), lambda i: (i, 0))),  # t
        ),
        compiler_params=pltpu.CompilerParams(
            dimension_semantics=("parallel",),      # megacore shard on v7x
            vmem_limit_bytes=vmem_limit),
        cost_estimate=pl.CostEstimate(
            flops=flops,
            transcendentals=padded_batch * dp,
            bytes_accessed=bytes_accessed),
    )(hp, params["w1"], params["b1"], params["w2"], params["b2"],
      params["w3"], params["b3"])

    return logs_p[:batch, :d], t_p[:batch, :d]


def nn_forward_ref(h, params):
    """Pure-JAX reference on the unpadded params."""
    d = h.shape[-1]
    x = jnp.maximum(h @ params["w1"] + params["b1"], 0.0)
    x = jnp.maximum(x @ params["w2"] + params["b2"], 0.0)
    y = x @ params["w3"] + params["b3"]
    logs = jax.nn.sigmoid(y[:, :d] + 2.0) + 1e-7
    t = y[:, d:]
    return logs, t


if __name__ == "__main__":
    dim = 64          # NN(dim) -> hidden width d = dim // 2 = 32
    batch = 8
    d = dim // 2

    key = jax.random.PRNGKey(0)
    k_h, k_p = jax.random.split(key)
    h = jax.random.normal(k_h, (batch, d), dtype=jnp.float32)
    params = init_params(k_p, dim)
    # Done once, lane-dense (128) layout.  For v6e/v7x production sizes pass
    # compute_dtype=jnp.bfloat16 here (f32 kept for an exact reference check).
    padded_params = pad_params(params)

    logs, t = nn_forward(h, padded_params)
    jax.block_until_ready((logs, t))

    logs_ref, t_ref = nn_forward_ref(h, params)
    assert logs.shape == (batch, d) and t.shape == (batch, d)
    assert jnp.allclose(logs, logs_ref, atol=1e-5, rtol=1e-5)
    assert jnp.allclose(t, t_ref, atol=1e-5, rtol=1e-5)

    print("KERNEL_OK")
</pallas_src>

<mosaic_0001>
module attributes {stable_mosaic.version = 11 : i64} {
  func.func @_nn_kernel(%arg0: i32, %arg1: memref<8x128xf32, #tpu.memory_space<vmem>>, %arg2: memref<128x128xf32, #tpu.memory_space<vmem>>, %arg3: memref<1x128xf32, #tpu.memory_space<vmem>>, %arg4: memref<128x128xf32, #tpu.memory_space<vmem>>, %arg5: memref<1x128xf32, #tpu.memory_space<vmem>>, %arg6: memref<128x256xf32, #tpu.memory_space<vmem>>, %arg7: memref<1x256xf32, #tpu.memory_space<vmem>>, %arg8: memref<8x128xf32, #tpu.memory_space<vmem>>, %arg9: memref<8x128xf32, #tpu.memory_space<vmem>>) attributes {dimension_semantics = [#tpu.dimension_semantics<parallel>], iteration_bounds = array<i64: 1>, scalar_prefetch = 0 : i64, scratch_operands = 0 : i64, tpu.core_type = #tpu.core_type<tc>, window_params = [{transform_indices = @transform_0, window_bounds = array<i64: 8, 128>}, {pipeline_mode = #tpu.pipeline_mode<synchronous>, transform_indices = @transform_1, window_bounds = array<i64: 128, 128>}, {pipeline_mode = #tpu.pipeline_mode<synchronous>, transform_indices = @transform_2, window_bounds = array<i64: 1, 128>}, {pipeline_mode = #tpu.pipeline_mode<synchronous>, transform_indices = @transform_3, window_bounds = array<i64: 128, 128>}, {pipeline_mode = #tpu.pipeline_mode<synchronous>, transform_indices = @transform_4, window_bounds = array<i64: 1, 128>}, {pipeline_mode = #tpu.pipeline_mode<synchronous>, transform_indices = @transform_5, window_bounds = array<i64: 128, 256>}, {pipeline_mode = #tpu.pipeline_mode<synchronous>, transform_indices = @transform_6, window_bounds = array<i64: 1, 256>}, {transform_indices = @transform_7, window_bounds = array<i64: 8, 128>}, {transform_indices = @transform_8, window_bounds = array<i64: 8, 128>}]} {
    %c0 = arith.constant 0 : index
    %c0_0 = arith.constant 0 : index
    %0 = vector.load %arg1[%c0, %c0_0] : memref<8x128xf32, #tpu.memory_space<vmem>>, vector<8x128xf32>
    %c0_1 = arith.constant 0 : index
    %c0_2 = arith.constant 0 : index
    %1 = vector.load %arg2[%c0_1, %c0_2] : memref<128x128xf32, #tpu.memory_space<vmem>>, vector<128x128xf32>
    %cst = arith.constant dense<0.000000e+00> : vector<8x128xf32>
    %2 = tpu.matmul %0, %1, %cst {dimension_numbers = #tpu.dot_dimension_numbers<[1], [0], [0], [1], [0, 0, 1, 1], [], []>} : vector<8x128xf32>, vector<128x128xf32>, vector<8x128xf32> -> vector<8x128xf32>
    %c0_3 = arith.constant 0 : index
    %c0_4 = arith.constant 0 : index
    %3 = vector.load %arg3[%c0_3, %c0_4] : memref<1x128xf32, #tpu.memory_space<vmem>>, vector<1x128xf32>
    %4 = vector.broadcast %3 : vector<1x128xf32> to vector<8x128xf32>
    %5 = arith.addf %2, %4 : vector<8x128xf32>
    %cst_5 = arith.constant 0.000000e+00 : f32
    %6 = vector.broadcast %cst_5 : f32 to vector<8x128xf32>
    %7 = arith.maximumf %5, %6 : vector<8x128xf32>
    %c0_6 = arith.constant 0 : index
    %c0_7 = arith.constant 0 : index
    %8 = vector.load %arg4[%c0_6, %c0_7] : memref<128x128xf32, #tpu.memory_space<vmem>>, vector<128x128xf32>
    %cst_8 = arith.constant dense<0.000000e+00> : vector<8x128xf32>
    %9 = tpu.matmul %7, %8, %cst_8 {dimension_numbers = #tpu.dot_dimension_numbers<[1], [0], [0], [1], [0, 0, 1, 1], [], []>} : vector<8x128xf32>, vector<128x128xf32>, vector<8x128xf32> -> vector<8x128xf32>
    %c0_9 = arith.constant 0 : index
    %c0_10 = arith.constant 0 : index
    %10 = vector.load %arg5[%c0_9, %c0_10] : memref<1x128xf32, #tpu.memory_space<vmem>>, vector<1x128xf32>
    %11 = vector.broadcast %10 : vector<1x128xf32> to vector<8x128xf32>
    %12 = arith.addf %9, %11 : vector<8x128xf32>
    %cst_11 = arith.constant 0.000000e+00 : f32
    %13 = vector.broadcast %cst_11 : f32 to vector<8x128xf32>
    %14 = arith.maximumf %12, %13 : vector<8x128xf32>
    %c0_12 = arith.constant 0 : index
    %c0_13 = arith.constant 0 : index
    %15 = vector.load %arg6[%c0_12, %c0_13] : memref<128x256xf32, #tpu.memory_space<vmem>>, vector<128x256xf32>
    %cst_14 = arith.constant dense<0.000000e+00> : vector<8x256xf32>
    %16 = tpu.matmul %14, %15, %cst_14 {dimension_numbers = #tpu.dot_dimension_numbers<[1], [0], [0], [1], [0, 0, 1, 1], [], []>} : vector<8x128xf32>, vector<128x256xf32>, vector<8x256xf32> -> vector<8x256xf32>
    %c0_15 = arith.constant 0 : index
    %c0_16 = arith.constant 0 : index
    %17 = vector.load %arg7[%c0_15, %c0_16] : memref<1x256xf32, #tpu.memory_space<vmem>>, vector<1x256xf32>
    %18 = vector.broadcast %17 : vector<1x256xf32> to vector<8x256xf32>
    %19 = arith.addf %16, %18 : vector<8x256xf32>
    %20 = vector.extract_strided_slice %19 {offsets = [0, 0], sizes = [8, 128], strides = [1, 1]} : vector<8x256xf32> to vector<8x128xf32>
    %cst_17 = arith.constant 2.000000e+00 : f32
    %21 = vector.broadcast %cst_17 : f32 to vector<8x128xf32>
    %22 = arith.addf %20, %21 : vector<8x128xf32>
    %23 = arith.negf %22 : vector<8x128xf32>
    %24 = math.exp %23 : vector<8x128xf32>
    %cst_18 = arith.constant 1.000000e+00 : f32
    %25 = vector.broadcast %cst_18 : f32 to vector<8x128xf32>
    %26 = arith.addf %25, %24 : vector<8x128xf32>
    %27 = arith.divf %25, %26 : vector<8x128xf32>
    %cst_19 = arith.constant 1.000000e-07 : f32
    %28 = vector.broadcast %cst_19 : f32 to vector<8x128xf32>
    %29 = arith.addf %27, %28 : vector<8x128xf32>
    %c0_20 = arith.constant 0 : index
    %c0_21 = arith.constant 0 : index
    %30 = vector.load %arg8[%c0_20, %c0_21] : memref<8x128xf32, #tpu.memory_space<vmem>>, vector<8x128xf32>
    tpu.vector_store %arg8[%c0_20, %c0_21], %29 {strides = array<i32>} : memref<8x128xf32, #tpu.memory_space<vmem>>, vector<8x128xf32>,
    %31 = vector.extract_strided_slice %19 {offsets = [0, 128], sizes = [8, 128], strides = [1, 1]} : vector<8x256xf32> to vector<8x128xf32>
    %c0_22 = arith.constant 0 : index
    %c0_23 = arith.constant 0 : index
    %32 = vector.load %arg9[%c0_22, %c0_23] : memref<8x128xf32, #tpu.memory_space<vmem>>, vector<8x128xf32>
    tpu.vector_store %arg9[%c0_22, %c0_23], %31 {strides = array<i32>} : memref<8x128xf32, #tpu.memory_space<vmem>>, vector<8x128xf32>,
    return
  }
  func.func @transform_0(%arg0: i32) -> (i32, i32) {
    %c0_i32 = arith.constant 0 : i32
    %c0_i32_0 = arith.constant 0 : i32
    return %arg0, %c0_i32 : i32, i32
  }
  func.func @transform_1(%arg0: i32) -> (i32, i32) {
    %c0_i32 = arith.constant 0 : i32
    %c0_i32_0 = arith.constant 0 : i32
    %c0_i32_1 = arith.constant 0 : i32
    return %c0_i32, %c0_i32_0 : i32, i32
  }
  func.func @transform_2(%arg0: i32) -> (i32, i32) {
    %c0_i32 = arith.constant 0 : i32
    %c0_i32_0 = arith.constant 0 : i32
    %c0_i32_1 = arith.constant 0 : i32
    return %c0_i32, %c0_i32_0 : i32, i32
  }
  func.func @transform_3(%arg0: i32) -> (i32, i32) {
    %c0_i32 = arith.constant 0 : i32
    %c0_i32_0 = arith.constant 0 : i32
    %c0_i32_1 = arith.constant 0 : i32
    return %c0_i32, %c0_i32_0 : i32, i32
  }
  func.func @transform_4(%arg0: i32) -> (i32, i32) {
    %c0_i32 = arith.constant 0 : i32
    %c0_i32_0 = arith.constant 0 : i32
    %c0_i32_1 = arith.constant 0 : i32
    return %c0_i32, %c0_i32_0 : i32, i32
  }
  func.func @transform_5(%arg0: i32) -> (i32, i32) {
    %c0_i32 = arith.constant 0 : i32
    %c0_i32_0 = arith.constant 0 : i32
    %c0_i32_1 = arith.constant 0 : i32
    return %c0_i32, %c0_i32_0 : i32, i32
  }
  func.func @transform_6(%arg0: i32) -> (i32, i32) {
    %c0_i32 = arith.constant 0 : i32
    %c0_i32_0 = arith.constant 0 : i32
    %c0_i32_1 = arith.constant 0 : i32
    return %c0_i32, %c0_i32_0 : i32, i32
  }
  func.func @transform_7(%arg0: i32) -> (i32, i32) {
    %c0_i32 = arith.constant 0 : i32
    %c0_i32_0 = arith.constant 0 : i32
    return %arg0, %c0_i32 : i32, i32
  }
  func.func @transform_8(%arg0: i32) -> (i32, i32) {
    %c0_i32 = arith.constant 0 : i32
    %c0_i32_0 = arith.constant 0 : i32
    return %arg0, %c0_i32 : i32, i32
  }
}

</mosaic_0001>

<bundles_post_ra>
// kernel: tpu_custom_call.1
= control target key start
LH: loop header
LB: loop body
LE: loop exit
PB: predicated region body
PF: predicated region fallthrough
CT: control target
= control target key end

     0   :  { %14 = vsyncpa [#allocation3], 0  ;;  %s800_s0 = inlined_call_operand.hbm [shape: f32[8,128], index: 0, kind: input, shape index: {}]   ;;  %s801_s1 = inlined_call_operand.hbm [shape: f32[128,128], index: 1, kind: input, shape index: {}]   ;;  %s802_s2 = inlined_call_operand.vmem [shape: f32[1,128], index: 2, kind: input, shape index: {}]   ;;  %s803_s3 = inlined_call_operand.hbm [shape: f32[128,128], index: 3, kind: input, shape index: {}]   ;;  %s804_s4 = inlined_call_operand.vmem [shape: f32[1,128], index: 4, kind: input, shape index: {}]   ;;  %s805_s5 = inlined_call_operand.hbm [shape: f32[128,256], index: 5, kind: input, shape index: {}]   ;;  %s806_s6 = inlined_call_operand.vmem [shape: f32[1,256], index: 6, kind: input, shape index: {}]   ;;  %s807_s7 = inlined_call_operand.hbm [shape: f32[8,128], index: 7, kind: output, shape index: {0}]   ;;  %s808_s8 = inlined_call_operand.hbm [shape: f32[8,128], index: 8, kind: output, shape index: {1}]  }
   0x1   :  { %15 = vsyncpa [#allocation6], 0 }
   0x2   :  { %16 = vsyncpa [#allocation9], 0 }
   0x3   :  { %17 = vsyncpa [#allocation4], 0 }
   0x4   :  { %18 = vsyncpa [#allocation12], 0  ;;  %s681_s27 = smov [#allocation5]  }
   0x5   :  { %s34_s28 = sshll.u32 %s681_s27, 4  ;;  %s35_s28 = int_to_ptr.vmem [resolvable:$true] %s34_s28 }
   0x6   :  { %s559_s29 = scalar_lea.vmem %s35_s28, 2048  ;;  %p564_p1 = scmp.lt.s32.totalorder %s35_s28, %s35_s28 }
   0x7   :  { %p560_p0 = scmp.ne.s32.totalorder %s35_s28, %s559_s29  ;;  %p565_p2 = scmp.lt.s32.totalorder %s559_s29, %s559_s29 }
   0x9   :  { %p566_p3 = por %p565_p2, %p564_p1 }
   0xb   :  { %p567_p4 = pnand %p566_p3, %p560_p0 }
   0xd   :  { %570 = shalt.err (!%p567_p4)
}
   0xe   :  { %s682_s30 = smov 128   ;;  %s683_s9 = smov 8  }
   0xf   :  { %40 = dma.hbm_to_vmem [thread:$0]  %s801_s1, 2048, %s35_s28, [#allocation6], %s682_s30, %s682_s30, %s683_s9  }
  0x10   :  { %s684_s12 = smov [#allocation2]   ;;  %s685_s14 = smov [#allocation7]  }
  0x11   :  { %s25_s13 = sshll.u32 %s684_s12, 4  ;;  %s48_s15 = sshll.u32 %s685_s14, 4  ;;  %s26_s13 = int_to_ptr.vmem [resolvable:$true] %s25_s13  ;;  %s49_s15 = int_to_ptr.vmem [resolvable:$true] %s48_s15 }
  0x12   :  { %s579_s16 = scalar_lea.vmem %s26_s13, 128  ;;  %p584_p6 = scmp.lt.s32.totalorder %s26_s13, %s26_s13 }
  0x13   :  { %p580_p5 = scmp.ne.s32.totalorder %s26_s13, %s579_s16  ;;  %p585_p7 = scmp.lt.s32.totalorder %s579_s16, %s579_s16 }
  0x15   :  { %p586_p8 = por %p585_p7, %p584_p6 }
  0x17   :  { %p587_p9 = pnand %p586_p8, %p580_p5 }
  0x19   :  { %590 = shalt.err (!%p587_p9)
}
  0x1a   :  { %28 = dma.hbm_to_vmem [thread:$0]  %s800_s0, 128, %s26_s13, [#allocation3]  }
  0x1b   :  { %s599_s19 = scalar_lea.vmem %s49_s15, 2048  ;;  %p604_p11 = scmp.lt.s32.totalorder %s49_s15, %s49_s15 }
  0x1c   :  { %p600_p10 = scmp.ne.s32.totalorder %s49_s15, %s599_s19  ;;  %p605_p12 = scmp.lt.s32.totalorder %s599_s19, %s599_s19 }
  0x1e   :  { %p606_p13 = por %p605_p12, %p604_p11 }
  0x20   :  { %p607_p0 = pnand %p606_p13, %p600_p10 }
  0x22   :  { %610 = shalt.err (!%p607_p0)
}
  0x23   :  { %54 = dma.hbm_to_vmem [thread:$0]  %s803_s3, 2048, %s49_s15, [#allocation6], %s682_s30, %s682_s30, %s683_s9  }
  0x24   :  { %s686_s21 = smov [#allocation8]  }
  0x25   :  { %s62_s22 = sshll.u32 %s686_s21, 4  ;;  %s63_s22 = int_to_ptr.vmem [resolvable:$true] %s62_s22 }
  0x26   :  { %s619_s23 = scalar_lea.vmem %s63_s22, 4096  ;;  %p624_p2 = scmp.lt.s32.totalorder %s63_s22, %s63_s22 }
  0x27   :  { %p620_p1 = scmp.ne.s32.totalorder %s63_s22, %s619_s23  ;;  %p625_p3 = scmp.lt.s32.totalorder %s619_s23, %s619_s23 }
  0x29   :  { %p626_p4 = por %p625_p3, %p624_p2 }
  0x2b   :  { %p627_p5 = pnand %p626_p4, %p620_p1 }
  0x2d   :  { %630 = shalt.err (!%p627_p5)
}
  0x2e   :  { %s687_s0 = smov 256   ;;  %s688_s24 = smov 16  }
  0x2f   :  { %68 = dma.hbm_to_vmem [thread:$0]  %s805_s5, 4096, %s63_s22, [#allocation9], %s687_s0, %s687_s0, %s688_s24  }
  0x30   :  { %671 = dma.done.wait [#allocation3], 128  }
  0x31   :  { %672 = vsyncadd [#allocation3], 4294967168 }
  0x32   :  { %673 = dma.done.wait [#allocation6], 4096  }
  0x33   :  { %674 = vsyncadd [#allocation6], 4294963200 }
  0x34   :  { %675 = dma.done.wait [#allocation9], 4096  }
  0x35   :  { %676 = vsyncadd [#allocation9], 4294963200  ;;  %v689_v0 = vmov 0.0   ;;  %vm690_vm0 = vmmov 0   ;;  %v99_v1 = vld [vmem:[#allocation5 + $0x78] sm:$0xff]  ;;  %v98_v2 = vld [vmem:[#allocation5 + $0x70] sm:$0xff] }
  0x36   :  { %465 = vmatprep.subr.mxu0 %v689_v0  ;;  %497 = vmatprep.mubr.msk.f32.mxu0 %vm690_vm0, %v689_v0  ;;  %v97_v3 = vld [vmem:[#allocation5 + $0x68] sm:$0xff]  ;;  %v96_v4 = vld [vmem:[#allocation5 + $0x60] sm:$0xff]  ;;  %v193_v5 = vld [vmem:[#allocation7 + $0x78] sm:$0xff]  ;;  %s691_s30 = smov [#allocation11]  }
  0x37   :  { %500 = vmatprep.subr.mxu1 %v689_v0  ;;  %532 = vmatprep.mubr.msk.f32.mxu1 %vm690_vm0, %v689_v0  ;;  %v95_v6 = vld [vmem:[#allocation5 + $0x58] sm:$0xff]  ;;  %v192_v7 = vld [vmem:[#allocation7 + $0x70] sm:$0xff]  ;;  %v191_v8 = vld [vmem:[#allocation7 + $0x68] sm:$0xff]  ;;  %s413_s9 = sshll.u32 %s691_s30, 4  ;;  %s414_s9 = int_to_ptr.vmem [resolvable:$true] %s413_s9 }
  0x38   :  { %466 = vmatpush3.msra.mxu0 %v99_v1  ;;  %501 = vmatpush3.msra.mxu1 %v193_v5  ;;  %v94_v9 = vld [vmem:[#allocation5 + $0x50] sm:$0xff]  ;;  %v190_v10 = vld [vmem:[#allocation7 + $0x60] sm:$0xff]  ;;  %v93_v11 = vld [vmem:[#allocation5 + $0x48] sm:$0xff]  ;;  %p636_p7 = scmp.lt.s32.totalorder %s414_s9, %s414_s9 }
  0x39   :  { %467 = vmatprep.subr.mxu0 %v689_v0  ;;  %502 = vmatprep.subr.mxu1 %v689_v0  ;;  %v189_v12 = vld [vmem:[#allocation7 + $0x58] sm:$0xff]  ;;  %v92_v13 = vld [vmem:[#allocation5 + $0x40] sm:$0xff]  ;;  %v188_v14 = vld [vmem:[#allocation7 + $0x50] sm:$0xff] }
  0x3a   :  { %468 = vmatpush3.msra.mxu0 %v98_v2  ;;  %503 = vmatpush3.msra.mxu1 %v192_v7  ;;  %v91_v15 = vld [vmem:[#allocation5 + $0x38] sm:$0xff]  ;;  %v187_v16 = vld [vmem:[#allocation7 + $0x48] sm:$0xff]  ;;  %v90_v17 = vld [vmem:[#allocation5 + $0x30] sm:$0xff] }
  0x3b   :  { %469 = vmatprep.subr.mxu0 %v689_v0  ;;  %504 = vmatprep.subr.mxu1 %v689_v0  ;;  %v186_v18 = vld [vmem:[#allocation7 + $0x40] sm:$0xff]  ;;  %v89_v19 = vld [vmem:[#allocation5 + $0x28] sm:$0xff]  ;;  %v185_v20 = vld [vmem:[#allocation7 + $0x38] sm:$0xff] }
  0x3c   :  { %470 = vmatpush3.msra.mxu0 %v97_v3  ;;  %505 = vmatpush3.msra.mxu1 %v191_v8  ;;  %v88_v21 = vld [vmem:[#allocation5 + $0x20] sm:$0xff]  ;;  %v184_v22 = vld [vmem:[#allocation7 + $0x30] sm:$0xff]  ;;  %v87_v23 = vld [vmem:[#allocation5 + $0x18] sm:$0xff] }
  0x3d   :  { %471 = vmatprep.subr.mxu0 %v689_v0  ;;  %506 = vmatprep.subr.mxu1 %v689_v0  ;;  %v183_v24 = vld [vmem:[#allocation7 + $0x28] sm:$0xff]  ;;  %v86_v25 = vld [vmem:[#allocation5 + $0x10] sm:$0xff]  ;;  %v182_v26 = vld [vmem:[#allocation7 + $0x20] sm:$0xff] }
  0x3e   :  { %472 = vmatpush3.msra.mxu0 %v96_v4  ;;  %507 = vmatpush3.msra.mxu1 %v190_v10  ;;  %v85_v27 = vld [vmem:[#allocation5 + $0x8] sm:$0xff]  ;;  %v181_v28 = vld [vmem:[#allocation7 + $0x18] sm:$0xff]  ;;  %v84_v29 = vld [vmem:[#allocation5] sm:$0xff] }
  0x3f   :  { %473 = vmatprep.subr.mxu0 %v689_v0  ;;  %508 = vmatprep.subr.mxu1 %v689_v0  ;;  %v83_v30 = vld [vmem:[#allocation2] sm:$0xff]  ;;  %v180_v31 = vld [vmem:[#allocation7 + $0x10] sm:$0xff]  ;;  %v179_v32 = vld [vmem:[#allocation7 + $0x8] sm:$0xff] }
  0x40   :  { %474 = vmatpush3.msra.mxu0 %v95_v6  ;;  %509 = vmatpush3.msra.mxu1 %v189_v12  ;;  %v178_v33 = vld [vmem:[#allocation7] sm:$0xff]  ;;  %v303_v34 = vld [vmem:[#allocation8 + $0xf8] sm:$0xff]  ;;  %v302_v35 = vld [vmem:[#allocation8 + $0xf0] sm:$0xff]  ;;  %v306_v12 = vlaneseq }
  0x41   :  { %475 = vmatprep.subr.mxu0 %v689_v0  ;;  %510 = vmatprep.subr.mxu1 %v689_v0  ;;  %v301_v36 = vld [vmem:[#allocation8 + $0xe8] sm:$0xff]  ;;  %v300_v37 = vld [vmem:[#allocation8 + $0xe0] sm:$0xff]  ;;  %v299_v38 = vld [vmem:[#allocation8 + $0xd8] sm:$0xff] }
  0x42   :  { %476 = vmatpush3.msra.mxu0 %v94_v9  ;;  %511 = vmatpush3.msra.mxu1 %v188_v14  ;;  %v298_v39 = vld [vmem:[#allocation8 + $0xd0] sm:$0xff]  ;;  %v297_v40 = vld [vmem:[#allocation8 + $0xc8] sm:$0xff]  ;;  %v296_v41 = vld [vmem:[#allocation8 + $0xc0] sm:$0xff] }
  0x43   :  { %477 = vmatprep.subr.mxu0 %v689_v0  ;;  %512 = vmatprep.subr.mxu1 %v689_v0  ;;  %v295_v42 = vld [vmem:[#allocation8 + $0xb8] sm:$0xff]  ;;  %v294_v43 = vld [vmem:[#allocation8 + $0xb0] sm:$0xff]  ;;  %v293_v44 = vld [vmem:[#allocation8 + $0xa8] sm:$0xff] }
  0x44   :  { %478 = vmatpush3.msra.mxu0 %v93_v11  ;;  %513 = vmatpush3.msra.mxu1 %v187_v16  ;;  %v292_v45 = vld [vmem:[#allocation8 + $0xa0] sm:$0xff]  ;;  %v291_v46 = vld [vmem:[#allocation8 + $0x98] sm:$0xff]  ;;  %v290_v47 = vld [vmem:[#allocation8 + $0x90] sm:$0xff] }
  0x45   :  { %479 = vmatprep.subr.mxu0 %v689_v0  ;;  %514 = vmatprep.subr.mxu1 %v689_v0  ;;  %v289_v48 = vld [vmem:[#allocation8 + $0x88] sm:$0xff]  ;;  %v288_v49 = vld [vmem:[#allocation8 + $0x80] sm:$0xff]  ;;  %v287_v50 = vld [vmem:[#allocation8 + $0x78] sm:$0xff] }
  0x46   :  { %480 = vmatpush3.msra.mxu0 %v92_v13  ;;  %515 = vmatpush3.msra.mxu1 %v186_v18  ;;  %v286_v51 = vld [vmem:[#allocation8 + $0x70] sm:$0xff]  ;;  %v285_v52 = vld [vmem:[#allocation8 + $0x68] sm:$0xff]  ;;  %v284_v53 = vld [vmem:[#allocation8 + $0x60] sm:$0xff]  ;;  %v307_v13 = vshrl.u32 %v306_v12, 7 }
  0x47   :  { %481 = vmatprep.subr.mxu0 %v689_v0  ;;  %516 = vmatprep.subr.mxu1 %v689_v0  ;;  %v283_v54 = vld [vmem:[#allocation8 + $0x58] sm:$0xff]  ;;  %v282_v55 = vld [vmem:[#allocation8 + $0x50] sm:$0xff]  ;;  %v281_v56 = vld [vmem:[#allocation8 + $0x48] sm:$0xff] }
  0x48   :  { %482 = vmatpush3.msra.mxu0 %v91_v15  ;;  %517 = vmatpush3.msra.mxu1 %v185_v20  ;;  %v280_v57 = vld [vmem:[#allocation8 + $0x40] sm:$0xff]  ;;  %v279_v58 = vld [vmem:[#allocation8 + $0x38] sm:$0xff]  ;;  %v278_v59 = vld [vmem:[#allocation8 + $0x30] sm:$0xff]  ;;  %v308_v14 = vsub.s32 0, %v307_v13  ;;  %v312_v16 = vsub.s32 1, %v307_v13 }
  0x49   :  { %483 = vmatprep.subr.mxu0 %v689_v0  ;;  %518 = vmatprep.subr.mxu1 %v689_v0  ;;  %v277_v60 = vld [vmem:[#allocation8 + $0x28] sm:$0xff]  ;;  %v428_v61 = vld [vmem:[%s802_s2] ss:$0 sm:$0xff]  ;;  %v276_v2 = vld [vmem:[#allocation8 + $0x20] sm:$0xff] }
  0x4a   :  { %484 = vmatpush3.msra.mxu0 %v90_v17  ;;  %519 = vmatpush3.msra.mxu1 %v184_v22  ;;  %v275_v3 = vld [vmem:[#allocation8 + $0x18] sm:$0xff]  ;;  %v274_v4 = vld [vmem:[#allocation8 + $0x10] sm:$0xff]  ;;  %v273_v5 = vld [vmem:[#allocation8 + $0x8] sm:$0xff] }
  0x4b   :  { %485 = vmatprep.subr.mxu0 %v689_v0  ;;  %520 = vmatprep.subr.mxu1 %v689_v0  ;;  %v272_v6 = vld [vmem:[#allocation8] sm:$0xff]  ;;  %v429_v7 = vld [vmem:[%s804_s4] ss:$0 sm:$0xff]  ;;  %s631_s4 = scalar_lea.vmem %s414_s9, 128 }
  0x4c   :  { %486 = vmatpush3.msra.mxu0 %v89_v19  ;;  %521 = vmatpush3.msra.mxu1 %v183_v24  ;;  %v304_v15 = vld [vmem:[%s806_s6] sm:$0x3]  ;;  %p632_p6 = scmp.ne.s32.totalorder %s414_s9, %s631_s4  ;;  %p637_p8 = scmp.lt.s32.totalorder %s631_s4, %s631_s4 }
  0x4d   :  { %487 = vmatprep.subr.mxu0 %v689_v0  ;;  %522 = vmatprep.subr.mxu1 %v689_v0  ;;  %v309_v17 = vrot.slane %v304_v15, %v308_v14  ;;  %v313_v18 = vrot.slane %v304_v15, %v312_v16 }
  0x4e   :  { %488 = vmatpush3.msra.mxu0 %v88_v21  ;;  %523 = vmatpush3.msra.mxu1 %v182_v26  ;;  %p638_p9 = por %p637_p8, %p636_p7 }
  0x4f   :  { %489 = vmatprep.subr.mxu0 %v689_v0  ;;  %524 = vmatprep.subr.mxu1 %v689_v0 }
  0x50   :  { %490 = vmatpush3.msra.mxu0 %v87_v23  ;;  %525 = vmatpush3.msra.mxu1 %v181_v28  ;;  %p639_p10 = pnand %p638_p9, %p632_p6 }
  0x51   :  { %491 = vmatprep.subr.mxu0 %v689_v0  ;;  %526 = vmatprep.subr.mxu1 %v689_v0 }
  0x52   :  { %492 = vmatpush3.msra.mxu0 %v86_v25  ;;  %527 = vmatpush3.msra.mxu1 %v180_v31 }
  0x53   :  { %493 = vmatprep.subr.mxu0 %v689_v0  ;;  %528 = vmatprep.subr.mxu1 %v689_v0 }
  0x54   :  { %494 = vmatpush3.msra.mxu0 %v85_v27  ;;  %529 = vmatpush3.msra.mxu1 %v179_v32 }
  0x55   :  { %495 = vmatprep.subr.mxu0 %v689_v0  ;;  %530 = vmatprep.subr.mxu1 %v689_v0 }
  0x56   :  { %496 = vmatpush3.msra.mxu0 %v84_v29  ;;  %531 = vmatpush3.msra.mxu1 %v178_v33 }
  0x57   :  { %498 = vmatmul.mubr.f32.vlgmr.msra.gmra.mxu0 %v83_v30  ;;  %316 = vmatprep.subr.mxu0 %v303_v34 }
  0x58   :  { %380 = vmatprep.mubr.f32.mxu0 %v689_v0  ;;  %317 = vmatpush1.msra.mxu0 %v302_v35 }
  0x59   :  { %318 = vmatprep.subr.mxu0 %v301_v36 }
  0x5a   :  { %319 = vmatpush1.msra.mxu0 %v300_v37 }
  0x5b   :  { %320 = vmatprep.subr.mxu0 %v299_v38 }
  0x5c   :  { %321 = vmatpush1.msra.mxu0 %v298_v39 }
  0x5d   :  { %322 = vmatprep.subr.mxu0 %v297_v40 }
  0x5e   :  { %323 = vmatpush1.msra.mxu0 %v296_v41 }
  0x5f   :  { %324 = vmatprep.subr.mxu0 %v295_v42 }
  0x60   :  { %325 = vmatpush1.msra.mxu0 %v294_v43 }
  0x61   :  { %326 = vmatprep.subr.mxu0 %v293_v44 }
  0x62   :  { %327 = vmatpush1.msra.mxu0 %v292_v45 }
  0x63   :  { %328 = vmatprep.subr.mxu0 %v291_v46 }
  0x64   :  { %329 = vmatpush1.msra.mxu0 %v290_v47 }
  0x65   :  { %330 = vmatprep.subr.mxu0 %v289_v48 }
  0x66   :  { %331 = vmatpush1.msra.mxu0 %v288_v49 }
  0x67   :  { %332 = vmatprep.subr.mxu0 %v287_v50 }
  0x68   :  { %333 = vmatpush1.msra.mxu0 %v286_v51 }
  0x69   :  { %334 = vmatprep.subr.mxu0 %v285_v52 }
  0x6a   :  { %335 = vmatpush1.msra.mxu0 %v284_v53 }
  0x6b   :  { %336 = vmatprep.subr.mxu0 %v283_v54 }
  0x6c   :  { %337 = vmatpush1.msra.mxu0 %v282_v55 }
  0x6d   :  { %338 = vmatprep.subr.mxu0 %v281_v56 }
  0x6e   :  { %339 = vmatpush1.msra.mxu0 %v280_v57 }
  0x6f   :  { %340 = vmatprep.subr.mxu0 %v279_v58 }
  0x70   :  { %341 = vmatpush1.msra.mxu0 %v278_v59 }
  0x71   :  { %342 = vmatprep.subr.mxu0 %v277_v60 }
  0x72   :  { %343 = vmatpush1.msra.mxu0 %v276_v2 }
  0x73   :  { %344 = vmatprep.subr.mxu0 %v275_v3 }
  0x74   :  { %345 = vmatpush1.msra.mxu0 %v274_v4 }
  0x75   :  { %346 = vmatprep.subr.mxu0 %v273_v5 }
  0x76   :  { %347 = vmatpush1.msra.mxu0 %v272_v6 }
 0x117   :  { %v173_v62 = vpop.f32.mrf.mxu0 }
 0x118   :  { %v174_v63 = vadd.f32 %v428_v61, %v173_v62 }
 0x119   :  { %v499_v0 = vpop.f32.mrf.mxu0 }
 0x11a   :  { %v177_v1 = vmax.f32 %v174_v63, 0.0 }
 0x11c   :  { %533 = vmatmul.mubr.f32.vlgmr.msra.gmra.mxu1 %v177_v1 }
 0x1dc   :  { %v267_v8 = vpop.f32.mrf.mxu1 }
 0x1dd   :  { %v268_v9 = vadd.f32 %v429_v7, %v267_v8 }
 0x1de   :  { %v534_v10 = vpop.f32.mrf.mxu1 }
 0x1df   :  { %v271_v11 = vmax.f32 %v268_v9, 0.0 }
 0x1e1   :  { %381 = vmatmul.mubr.f32.vlgmr.msra.gmra.mxu0 %v271_v11 }
 0x2a1   :  { %v382_v19 = vpop.f32.mrf.mxu0 }
 0x2a2   :  { %v383_v20 = vadd.f32 %v382_v19, %v309_v17 }
 0x2a3   :  { %v384_v21 = vpop.f32.mrf.mxu0 }
 0x2a4   :  { %v387_v22 = vadd.f32 2.0, %v383_v20  ;;  %v385_v23 = vadd.f32 %v384_v21, %v313_v18 }
 0x2a6   :  { %v430_v24 = vmul.f32 -1.442695, %v387_v22  ;;  %396 = vst [vmem:[#allocation11] sm:$0xff] %v385_v23 }
 0x2a7   :  { %642 = shalt.err (!%p639_p10)
}
 0x2a8   :  { %416 = dma.vmem_to_hbm [thread:$0]  %s414_s9, 128, %s808_s8, [#allocation12]   ;;  %547 = vpow2.f32 %v430_v24 }
 0x2a9   :  { %s692_s11 = smov [#allocation10]  }
 0x2aa   :  { %s403_s12 = sshll.u32 %s692_s11, 4  ;;  %s404_s12 = int_to_ptr.vmem [resolvable:$true] %s403_s12 }
 0x2ab   :  { %s651_s13 = scalar_lea.vmem %s404_s12, 128  ;;  %p656_p12 = scmp.lt.s32.totalorder %s404_s12, %s404_s12 }
 0x2ac   :  { %p652_p11 = scmp.ne.s32.totalorder %s404_s12, %s651_s13  ;;  %p657_p13 = scmp.lt.s32.totalorder %s651_s13, %s651_s13 }
 0x2ae   :  { %p658_p0 = por %p657_p13, %p656_p12 }
 0x2b0   :  { %p659_p1 = pnand %p658_p0, %p652_p11 }
 0x2b5   :  { %v548_v25 = vpop.eup %547 }
 0x2b6   :  { %v391_v26 = vadd.f32 1.0, %v548_v25 }
 0x2b8   :  { %549 = vrcp.f32 %v391_v26 }
 0x2c5   :  { %v550_v27 = vpop.eup %549 }
 0x2c6   :  { %v394_v28 = vadd.f32 1e-07, %v550_v27 }
 0x2c8   :  { %395 = vst [vmem:[#allocation10] sm:$0xff] %v394_v28 }
 0x2c9   :  { %662 = shalt.err (!%p659_p1)
}
 0x2ca   :  { %406 = dma.vmem_to_hbm [thread:$0]  %s404_s12, 128, %s807_s7, [#allocation4]  }
 0x2cb   :  { %677 = dma.done.wait [#allocation4], 128  }
 0x2cc   :  { %678 = vsyncadd [#allocation4], 4294967168 }
 0x2cd   :  { %679 = dma.done.wait [#allocation12], 128  }
 0x2ce   :  { %680 = vsyncadd [#allocation12], 4294967168 }
 0x2cf   :  { %423 = vsyncpa [#allocation3], 1 }
 0x2d0   :  { %424 = vsyncpa [#allocation6], 1 }
 0x2d1   :  { %425 = vsyncpa [#allocation9], 1 }
 0x2d2   :  { %426 = vsyncpa [#allocation4], 1 }
 0x2d3   :  { %427 = vsyncpa [#allocation12], 1 }

</bundles_post_ra>
